<compile_context>
chip_gen: v7x
topology: tpu7x:2x2x1
jax: 0.10.0
libtpu: 0.0.40
codegen_flags: <defaults>
</compile_context>

<pallas_src>
import jax
import jax.numpy as jnp
from jax.experimental import pallas as pl
from jax.experimental.pallas import tpu as pltpu


def mlp2_kernel(xT_ref, w1_ref, b1_ref, w2_ref, b2_ref, w3_ref, b3_ref, o_ref):
    # xT_ref : (D, tb) in compute dtype (bf16 by default); weights in the same
    # compute dtype; biases in f32 with shape (out, 1).  All accumulation and
    # elementwise math happens in f32.
    xT = xT_ref[...]
    cdt = xT.dtype

    # layer 1: h^T = relu(W1 @ x^T + b1)
    h = jnp.dot(w1_ref[...], xT, preferred_element_type=jnp.float32) + b1_ref[...]
    h = jnp.maximum(h, 0.0)

    # layer 2: h^T = relu(W2 @ h^T + b2)   (cast to bf16 only for the MXU)
    h = jnp.dot(w2_ref[...], h.astype(cdt), preferred_element_type=jnp.float32) + b2_ref[...]
    h = jnp.maximum(h, 0.0)

    # layer 3: z^T = W3 @ h^T + b3 ; out = sigmoid(z^T)
    z = jnp.dot(w3_ref[...], h.astype(cdt), preferred_element_type=jnp.float32) + b3_ref[...]
    o_ref[...] = jax.nn.sigmoid(z).astype(o_ref.dtype)


def _round_up(n, m):
    return ((n + m - 1) // m) * m


def _tile_bytes(rows, cols, dtype):
    """VMEM bytes for a (rows, cols) tile including sublane/lane padding."""
    it = jnp.dtype(dtype).itemsize
    sub = 8 * (4 // it) if it < 4 else 8  # 8 sublanes for f32, 16 for bf16
    return _round_up(max(rows, 1), sub) * _round_up(max(cols, 1), 128) * it


def mlp2_forward(x, params, *, block_b=8192, compute_dtype=jnp.bfloat16):
    """x: (B, D) float32.  Returns (B, 1, 3) float32, like the PyTorch module.

    params        : (w1, b1, w2, b2, w3, b3) in PyTorch layout, w: (out, in), b: (out,)
    block_b       : batch tile size in lanes (multiple of 128)
    compute_dtype : dtype fed to the MXU (bf16 default; f32 gives the exact path)
    """
    w1, b1, w2, b2, w3, b3 = params
    B, D = x.shape
    H = w1.shape[0]
    n_out = w3.shape[0]

    LANE = 128
    # Batch sits on the lane axis: pad to a lane multiple.
    padded_b = _round_up(B, LANE)
    tb = min(_round_up(block_b, LANE), padded_b)
    # Keep >= 2 grid steps when the batch allows it (v7x: 2 TensorCores).
    if padded_b > LANE and padded_b // tb < 2:
        tb = _round_up(padded_b // 2, LANE)
    padded_b = _round_up(B, tb)
    grid = (padded_b // tb,)

    # Transpose once in the wrapper (negligible vs. compute) and cast to the
    # MXU compute dtype.  x^T: (D, padded_b), batch on lanes.
    xT = jnp.pad(x.T, ((0, 0), (0, padded_b - B))).astype(compute_dtype)

    # Weights in compute dtype (bf16 by default); biases stay f32 as (out, 1).
    w1c = w1.astype(compute_dtype)
    w2c = w2.astype(compute_dtype)
    w3c = w3.astype(compute_dtype)
    b1c = b1.reshape(H, 1).astype(jnp.float32)
    b2c = b2.reshape(H, 1).astype(jnp.float32)
    b3c = b3.reshape(n_out, 1).astype(jnp.float32)

    # VMEM budget with lane/sublane padding accounted for.  Actual need is a
    # few MiB; cap at 32 MiB so v7x (64 MiB physical per TC) keeps headroom.
    weight_bytes = (
        _tile_bytes(*w1c.shape, compute_dtype) + _tile_bytes(*w2c.shape, compute_dtype)
        + _tile_bytes(*w3c.shape, compute_dtype)
        + _tile_bytes(*b1c.shape, jnp.float32) + _tile_bytes(*b2c.shape, jnp.float32)
        + _tile_bytes(*b3c.shape, jnp.float32)
    )
    vmem_need = (
        2 * _tile_bytes(D, tb, compute_dtype)        # double-buffered x^T tile
        + 2 * _tile_bytes(n_out, tb, jnp.float32)    # double-buffered out tile
        + 2 * weight_bytes                           # resident weights (dbl-buffered)
        + 3 * _tile_bytes(H, tb, jnp.float32)        # in-register hidden activations
    )
    vmem_limit = int(min(32 << 20, max(16 << 20, vmem_need + (4 << 20))))

    # Advisory cost estimate so XLA schedules surrounding ops sensibly.
    flops = 2 * B * (D * H + H * H + H * n_out)
    bytes_accessed = (
        padded_b * D * jnp.dtype(compute_dtype).itemsize
        + padded_b * n_out * 4
        + weight_bytes
    )
    cost = pl.CostEstimate(
        flops=flops, transcendentals=B * n_out, bytes_accessed=bytes_accessed
    )

    const = lambda i: (0, 0)  # weights/biases: same block every grid step
    out_t = pl.pallas_call(
        mlp2_kernel,
        out_shape=jax.ShapeDtypeStruct((n_out, padded_b), jnp.float32),
        grid=grid,
        in_specs=[
            pl.BlockSpec((D, tb), lambda i: (0, i)),   # x^T: lane-tiled over batch
            pl.BlockSpec(w1c.shape, const),            # w1 resident
            pl.BlockSpec(b1c.shape, const),            # b1 resident
            pl.BlockSpec(w2c.shape, const),            # w2 resident
            pl.BlockSpec(b2c.shape, const),            # b2 resident
            pl.BlockSpec(w3c.shape, const),            # w3 resident
            pl.BlockSpec(b3c.shape, const),            # b3 resident
        ],
        out_specs=pl.BlockSpec((n_out, tb), lambda i: (0, i)),  # lane-dense out slab
        compiler_params=pltpu.CompilerParams(
            dimension_semantics=("parallel",),
            vmem_limit_bytes=vmem_limit,
        ),
        cost_estimate=cost,
    )(xT, w1c, b1c, w2c, b2c, w3c, b3c)

    # (n_out, padded_b) -> (B, 1, n_out), matching the PyTorch forward.
    return out_t[:, :B].T.reshape(B, 1, n_out)


def init_params(key, n_state, n_control, neurons):
    """Deterministic init mirroring torch.nn.Linear defaults, PyTorch layout."""
    d_in = 3 * n_state + 2 * n_control
    dims = [(d_in, neurons), (neurons, neurons), (neurons, 3)]
    params = []
    for fan_in, fan_out in dims:
        key, kw, kb = jax.random.split(key, 3)
        bound = 1.0 / (fan_in ** 0.5)
        w = jax.random.uniform(kw, (fan_out, fan_in), jnp.float32, -bound, bound)
        b = jax.random.uniform(kb, (fan_out,), jnp.float32, -bound, bound)
        params += [w, b]
    return tuple(params)


def mlp2_reference(x, params):
    """Pure-JAX f32 reference (PyTorch-layout weights) for correctness checks."""
    w1, b1, w2, b2, w3, b3 = params
    h = jnp.maximum(x @ w1.T + b1, 0.0)
    h = jnp.maximum(h @ w2.T + b2, 0.0)
    z = h @ w3.T + b3
    return jax.nn.sigmoid(z).reshape(x.shape[0], 1, 3)


if __name__ == "__main__":
    # Small, forward-consistent shapes.
    n_state, n_control, neurons, steps = 4, 2, 32, 8
    batch = 8
    d_in = 3 * n_state + 2 * n_control  # 16

    key = jax.random.PRNGKey(0)
    key, kx = jax.random.split(key)
    x = jax.random.normal(kx, (batch, d_in), jnp.float32)
    params = init_params(key, n_state, n_control, neurons)

    y_ref = mlp2_reference(x, params)

    # Exact-math path (f32 operands): must match the reference tightly.
    y_f32 = jax.block_until_ready(mlp2_forward(x, params, compute_dtype=jnp.float32))
    assert y_f32.shape == (batch, 1, 3), y_f32.shape
    assert jnp.allclose(y_f32, y_ref, atol=1e-5, rtol=1e-5), "f32 mismatch vs reference"

    # Fast path (bf16 MXU operands for x, weights, and inter-layer activations;
    # f32 accumulation + f32 elementwise): tolerance covers bf16 rounding of
    # x, the weights, and the hidden activations.
    y_bf16 = jax.block_until_ready(mlp2_forward(x, params, compute_dtype=jnp.bfloat16))
    assert y_bf16.shape == (batch, 1, 3), y_bf16.shape
    assert jnp.allclose(y_bf16, y_ref, atol=3e-2, rtol=3e-2), "bf16 mismatch vs reference"

    print("KERNEL_OK")
</pallas_src>

<mosaic_0001>
module attributes {stable_mosaic.version = 11 : i64} {
  func.func @mlp2_kernel(%arg0: i32, %arg1: memref<16x128xf32, #tpu.memory_space<vmem>>, %arg2: memref<32x16xf32, #tpu.memory_space<vmem>>, %arg3: memref<32x1xf32, #tpu.memory_space<vmem>>, %arg4: memref<32x32xf32, #tpu.memory_space<vmem>>, %arg5: memref<32x1xf32, #tpu.memory_space<vmem>>, %arg6: memref<3x32xf32, #tpu.memory_space<vmem>>, %arg7: memref<3x1xf32, #tpu.memory_space<vmem>>, %arg8: memref<3x128xf32, #tpu.memory_space<vmem>>) attributes {dimension_semantics = [#tpu.dimension_semantics<parallel>], iteration_bounds = array<i64: 1>, scalar_prefetch = 0 : i64, scratch_operands = 0 : i64, tpu.core_type = #tpu.core_type<tc>, window_params = [{transform_indices = @transform_0, window_bounds = array<i64: 16, 128>}, {pipeline_mode = #tpu.pipeline_mode<synchronous>, transform_indices = @transform_1, window_bounds = array<i64: 32, 16>}, {pipeline_mode = #tpu.pipeline_mode<synchronous>, transform_indices = @transform_2, window_bounds = array<i64: 32, 1>}, {pipeline_mode = #tpu.pipeline_mode<synchronous>, transform_indices = @transform_3, window_bounds = array<i64: 32, 32>}, {pipeline_mode = #tpu.pipeline_mode<synchronous>, transform_indices = @transform_4, window_bounds = array<i64: 32, 1>}, {pipeline_mode = #tpu.pipeline_mode<synchronous>, transform_indices = @transform_5, window_bounds = array<i64: 3, 32>}, {pipeline_mode = #tpu.pipeline_mode<synchronous>, transform_indices = @transform_6, window_bounds = array<i64: 3, 1>}, {transform_indices = @transform_7, window_bounds = array<i64: 3, 128>}]} {
    %c0 = arith.constant 0 : index
    %c0_0 = arith.constant 0 : index
    %0 = vector.load %arg1[%c0, %c0_0] : memref<16x128xf32, #tpu.memory_space<vmem>>, vector<16x128xf32>
    %c0_1 = arith.constant 0 : index
    %c0_2 = arith.constant 0 : index
    %1 = vector.load %arg2[%c0_1, %c0_2] : memref<32x16xf32, #tpu.memory_space<vmem>>, vector<32x16xf32>
    %cst = arith.constant dense<0.000000e+00> : vector<32x128xf32>
    %2 = tpu.matmul %1, %0, %cst {dimension_numbers = #tpu.dot_dimension_numbers<[1], [0], [0], [1], [0, 0, 1, 1], [], []>} : vector<32x16xf32>, vector<16x128xf32>, vector<32x128xf32> -> vector<32x128xf32>
    %c0_3 = arith.constant 0 : index
    %c0_4 = arith.constant 0 : index
    %3 = vector.load %arg3[%c0_3, %c0_4] : memref<32x1xf32, #tpu.memory_space<vmem>>, vector<32x1xf32>
    %4 = vector.broadcast %3 : vector<32x1xf32> to vector<32x128xf32>
    %5 = arith.addf %2, %4 : vector<32x128xf32>
    %cst_5 = arith.constant 0.000000e+00 : f32
    %6 = vector.broadcast %cst_5 : f32 to vector<32x128xf32>
    %7 = arith.maximumf %5, %6 : vector<32x128xf32>
    %c0_6 = arith.constant 0 : index
    %c0_7 = arith.constant 0 : index
    %8 = vector.load %arg4[%c0_6, %c0_7] : memref<32x32xf32, #tpu.memory_space<vmem>>, vector<32x32xf32>
    %cst_8 = arith.constant dense<0.000000e+00> : vector<32x128xf32>
    %9 = tpu.matmul %8, %7, %cst_8 {dimension_numbers = #tpu.dot_dimension_numbers<[1], [0], [0], [1], [0, 0, 1, 1], [], []>} : vector<32x32xf32>, vector<32x128xf32>, vector<32x128xf32> -> vector<32x128xf32>
    %c0_9 = arith.constant 0 : index
    %c0_10 = arith.constant 0 : index
    %10 = vector.load %arg5[%c0_9, %c0_10] : memref<32x1xf32, #tpu.memory_space<vmem>>, vector<32x1xf32>
    %11 = vector.broadcast %10 : vector<32x1xf32> to vector<32x128xf32>
    %12 = arith.addf %9, %11 : vector<32x128xf32>
    %cst_11 = arith.constant 0.000000e+00 : f32
    %13 = vector.broadcast %cst_11 : f32 to vector<32x128xf32>
    %14 = arith.maximumf %12, %13 : vector<32x128xf32>
    %c0_12 = arith.constant 0 : index
    %c0_13 = arith.constant 0 : index
    %15 = vector.load %arg6[%c0_12, %c0_13] : memref<3x32xf32, #tpu.memory_space<vmem>>, vector<3x32xf32>
    %cst_14 = arith.constant dense<0.000000e+00> : vector<3x128xf32>
    %16 = tpu.matmul %15, %14, %cst_14 {dimension_numbers = #tpu.dot_dimension_numbers<[1], [0], [0], [1], [0, 0, 1, 1], [], []>} : vector<3x32xf32>, vector<32x128xf32>, vector<3x128xf32> -> vector<3x128xf32>
    %c0_15 = arith.constant 0 : index
    %c0_16 = arith.constant 0 : index
    %17 = vector.load %arg7[%c0_15, %c0_16] : memref<3x1xf32, #tpu.memory_space<vmem>>, vector<3x1xf32>
    %18 = vector.broadcast %17 : vector<3x1xf32> to vector<3x128xf32>
    %19 = arith.addf %16, %18 : vector<3x128xf32>
    %20 = arith.negf %19 : vector<3x128xf32>
    %21 = math.exp %20 : vector<3x128xf32>
    %cst_17 = arith.constant 1.000000e+00 : f32
    %22 = vector.broadcast %cst_17 : f32 to vector<3x128xf32>
    %23 = arith.addf %22, %21 : vector<3x128xf32>
    %24 = arith.divf %22, %23 : vector<3x128xf32>
    %c0_18 = arith.constant 0 : index
    %c0_19 = arith.constant 0 : index
    %25 = vector.load %arg8[%c0_18, %c0_19] : memref<3x128xf32, #tpu.memory_space<vmem>>, vector<3x128xf32>
    tpu.vector_store %arg8[%c0_18, %c0_19], %24 {strides = array<i32>} : memref<3x128xf32, #tpu.memory_space<vmem>>, vector<3x128xf32>,
    return
  }
  func.func @transform_0(%arg0: i32) -> (i32, i32) {
    %c0_i32 = arith.constant 0 : i32
    %c0_i32_0 = arith.constant 0 : i32
    return %c0_i32, %arg0 : i32, i32
  }
  func.func @transform_1(%arg0: i32) -> (i32, i32) {
    %c0_i32 = arith.constant 0 : i32
    %c0_i32_0 = arith.constant 0 : i32
    %c0_i32_1 = arith.constant 0 : i32
    return %c0_i32, %c0_i32_0 : i32, i32
  }
  func.func @transform_2(%arg0: i32) -> (i32, i32) {
    %c0_i32 = arith.constant 0 : i32
    %c0_i32_0 = arith.constant 0 : i32
    %c0_i32_1 = arith.constant 0 : i32
    return %c0_i32, %c0_i32_0 : i32, i32
  }
  func.func @transform_3(%arg0: i32) -> (i32, i32) {
    %c0_i32 = arith.constant 0 : i32
    %c0_i32_0 = arith.constant 0 : i32
    %c0_i32_1 = arith.constant 0 : i32
    return %c0_i32, %c0_i32_0 : i32, i32
  }
  func.func @transform_4(%arg0: i32) -> (i32, i32) {
    %c0_i32 = arith.constant 0 : i32
    %c0_i32_0 = arith.constant 0 : i32
    %c0_i32_1 = arith.constant 0 : i32
    return %c0_i32, %c0_i32_0 : i32, i32
  }
  func.func @transform_5(%arg0: i32) -> (i32, i32) {
    %c0_i32 = arith.constant 0 : i32
    %c0_i32_0 = arith.constant 0 : i32
    %c0_i32_1 = arith.constant 0 : i32
    return %c0_i32, %c0_i32_0 : i32, i32
  }
  func.func @transform_6(%arg0: i32) -> (i32, i32) {
    %c0_i32 = arith.constant 0 : i32
    %c0_i32_0 = arith.constant 0 : i32
    %c0_i32_1 = arith.constant 0 : i32
    return %c0_i32, %c0_i32_0 : i32, i32
  }
  func.func @transform_7(%arg0: i32) -> (i32, i32) {
    %c0_i32 = arith.constant 0 : i32
    %c0_i32_0 = arith.constant 0 : i32
    return %c0_i32, %arg0 : i32, i32
  }
}

</mosaic_0001>

<bundles_post_ra>
// kernel: tpu_custom_call.1
= control target key start
LH: loop header
LB: loop body
LE: loop exit
PB: predicated region body
PF: predicated region fallthrough
CT: control target
= control target key end

     0   :  { %vm57_vm0 = vcmask 130048   ;;  %v507_v4 = vmov 0   ;;  %s633_s0 = inlined_call_operand.vmem [shape: f32[16,128], index: 0, kind: input, shape index: {}]   ;;  %s634_s1 = inlined_call_operand.vmem [shape: f32[32,16], index: 1, kind: input, shape index: {}]   ;;  %s635_s2 = inlined_call_operand.vmem [shape: f32[32,1], index: 2, kind: input, shape index: {}]   ;;  %s636_s3 = inlined_call_operand.vmem [shape: f32[32,32], index: 3, kind: input, shape index: {}]   ;;  %s637_s4 = inlined_call_operand.vmem [shape: f32[32,1], index: 4, kind: input, shape index: {}]   ;;  %s638_s5 = inlined_call_operand.vmem [shape: f32[3,32], index: 5, kind: input, shape index: {}]   ;;  %s639_s6 = inlined_call_operand.vmem [shape: f32[3,1], index: 6, kind: input, shape index: {}]   ;;  %s640_s7 = inlined_call_operand.hbm [shape: f32[3,128], index: 7, kind: output, shape index: {}]  }
   0x1   :  { %v27_v0 = vld [vmem:[%s633_s0] sm:$0xff]  ;;  %v28_v1 = vld [vmem:[%s633_s0 + $0x8] sm:$0xff]  ;;  %477 = vset.pattern.permute.xlu0 %v507_v4  ;;  %478 = vset.pattern.permute.xlu1 %v507_v4  ;;  %v35_v6 = vld [vmem:[%s635_s2 + $0x10] sm:$0xff] }
   0x2   :  { %v29_v2 = vld [vmem:[%s634_s1] sm:$0xff]  ;;  %v454_v3 = vpack.c.bf16 %v28_v1, %v27_v0  ;;  %v30_v7 = vld [vmem:[%s634_s1 + $0x8] sm:$0xff]  ;;  %49 = vperm.xlu1 %478, %v35_v6   ;;  %v31_v9 = vld [vmem:[%s634_s1 + $0x10] sm:$0xff] }
   0x3   :  { %423 = vmatprep.mubr.msk.f32.mxu0 %vm57_vm0, %v29_v2  ;;  %v33_v5 = vld [vmem:[%s635_s2] sm:$0xff]  ;;  %v34_v8 = vld [vmem:[%s635_s2 + $0x8] sm:$0xff]  ;;  %v36_v10 = vld [vmem:[%s635_s2 + $0x18] sm:$0xff] }
   0x4   :  { %455 = vmatprep.subr.bf16.mxu0 %v454_v3  ;;  %39 = vperm.xlu0 %477, %v33_v5  }
   0x5   :  { %457 = vmatpush3.bf16.msra.mxu0 %v454_v3 }
   0x6   :  { %12 = vsyncpa [#allocation3], 0  ;;  %v32_v11 = vld [vmem:[%s634_s1 + $0x18] sm:$0xff]  ;;  %v163_v12 = vld [vmem:[%s637_s4] sm:$0xff]  ;;  %54 = vperm.xlu1 %478, %v36_v10   ;;  %vm187_vm1 = vcmask 261120   ;;  %v508_v39 = vmov 0.0|0.0  }
   0x7   :  { %v164_v13 = vld [vmem:[%s637_s4 + $0x8] sm:$0xff]  ;;  %v165_v14 = vld [vmem:[%s637_s4 + $0x10] sm:$0xff]  ;;  %v166_v15 = vld [vmem:[%s637_s4 + $0x18] sm:$0xff]  ;;  %466 = vmatprep.subr.bf16.mxu0 %v508_v39  ;;  %vm509_vm2 = vmmov 0   ;;  %v510_v40 = vmov 0.0   ;;  %s511_s11 = smov [#allocation2]  }
   0x8   :  { %424 = vmatmul.mubr.msk.f32.vlgmr.msra.gmra.mrb[0].mxu0 %vm57_vm0, %v30_v7  ;;  %44 = vperm.xlu0 %477, %v34_v8   ;;  %v290_v16 = vld [vmem:[%s639_s6] sm:$0x7]  ;;  %v160_v36 = vld [vmem:[%s636_s3 + $0x8] sm:$0xff]  ;;  %v161_v37 = vld [vmem:[%s636_s3 + $0x10] sm:$0xff]  ;;  %s382_s12 = sshll.u32 %s511_s11, 4  ;;  %s383_s12 = int_to_ptr.vmem [resolvable:$true] %s382_s12 }
   0x9   :  { %426 = vmatprep.mubr.msk.f32.mxu0 %vm57_vm0, %v31_v9  ;;  %v159_v17 = vld [vmem:[%s636_s3] sm:$0xff]  ;;  %v162_v38 = vld [vmem:[%s636_s3 + $0x18] sm:$0xff]  ;;  %s483_s13 = scalar_lea.vmem %s383_s12, 64  ;;  %p488_p1 = scmp.lt.s32.totalorder %s383_s12, %s383_s12 }
   0xa   :  { %174 = vperm.xlu1 %478, %v164_v13   ;;  %437 = vmatprep.mubr.msk.f32.mxu1 %vm187_vm1, %v159_v17  ;;  %v289_v59 = vld [vmem:[%s638_s5] sm:$0x7]  ;;  %p484_p0 = scmp.ne.s32.totalorder %s383_s12, %s483_s13  ;;  %p489_p2 = scmp.lt.s32.totalorder %s483_s13, %s483_s13 }
   0xc   :  { %427 = vmatmul.mubr.msk.f32.gmra.mrb[2].mxu0 %vm57_vm0, %v32_v11  ;;  %169 = vperm.xlu0 %477, %v163_v12   ;;  %p490_p3 = por %p489_p2, %p488_p1 }
   0xd   :  { %451 = vmatprep.mubr.msk.f32.mxu0 %vm509_vm2, %v510_v40 }
   0xe   :  { %184 = vperm.xlu1 %478, %v166_v15   ;;  %p491_p4 = pnand %p490_p3, %p484_p0 }
  0x10   :  { %179 = vperm.xlu0 %477, %v165_v14  }
  0x14   :  { %293 = vperm.xlu0 %477, %v290_v16  }
  0x81   :  { %v50_v19 = vpop.permute.xlu1 %49 }
  0x83   :  { %v40_v18 = vpop.permute.xlu0 %39 }
  0x85   :  { %v55_v26 = vpop.permute.xlu1 %54 }
  0x87   :  { %v45_v20 = vpop.permute.xlu0 %44 }
  0x89   :  { %v175_v41 = vpop.permute.xlu1 %174 }
  0x8b   :  { %v170_v42 = vpop.permute.xlu0 %169 }
  0x8d   :  { %v185_v48 = vpop.permute.xlu1 %184 }
  0x8f   :  { %v180_v51 = vpop.permute.xlu0 %179 }
  0x93   :  { %v294_v60 = vpop.permute.xlu0 %293 }
  0xdb   :  { %v425_v21 = vpop.f32.mrb[0].mxu0 }
  0xdc   :  { %v142_v22 = vadd.f32 %v425_v21, %v45_v20  ;;  %v136_v23 = vpop.f32.mrb[1].mxu0 }
  0xdd   :  { %v137_v24 = vadd.f32 %v136_v23, %v40_v18 }
  0xde   :  { %v156_v25 = vmax.f32 %v142_v22, 0.0 }
  0xdf   :  { %v155_v27 = vmax.f32 %v137_v24, 0.0  ;;  %v428_v28 = vpop.f32.mrb[2].mxu0 }
  0xe0   :  { %v152_v29 = vadd.f32 %v428_v28, %v55_v26  ;;  %v146_v30 = vpop.f32.mrb[3].mxu0 }
  0xe1   :  { %v147_v31 = vadd.f32 %v146_v30, %v50_v19  ;;  %v458_v32 = vpack.c.bf16 %v156_v25, %v155_v27 }
  0xe2   :  { %v158_v33 = vmax.f32 %v152_v29, 0.0 }
  0xe3   :  { %v157_v34 = vmax.f32 %v147_v31, 0.0  ;;  %459 = vmatprep.subr.bf16.mxu1 %v458_v32 }
  0xe4   :  { %461 = vmatpush3.bf16.msra.mxu1 %v458_v32 }
  0xe5   :  { %v462_v35 = vpack.c.bf16 %v158_v33, %v157_v34 }
  0xe7   :  { %463 = vmatprep.subr.bf16.mxu1 %v462_v35 }
  0xe8   :  { %465 = vmatpush3.bf16.msra.mxu1 %v462_v35 }
  0xeb   :  { %438 = vmatmul.mubr.msk.f32.vlgmr.msra.gmra.mrb[0].mxu1 %vm187_vm1, %v160_v36 }
  0xec   :  { %440 = vmatprep.mubr.msk.f32.mxu1 %vm187_vm1, %v161_v37 }
  0xef   :  { %441 = vmatmul.mubr.msk.f32.gmra.mrb[2].mxu1 %vm187_vm1, %v162_v38 }
 0x1be   :  { %v439_v43 = vpop.f32.mrb[0].mxu1 }
 0x1bf   :  { %v272_v44 = vadd.f32 %v439_v43, %v175_v41  ;;  %v266_v45 = vpop.f32.mrb[1].mxu1 }
 0x1c0   :  { %v267_v46 = vadd.f32 %v266_v45, %v170_v42 }
 0x1c1   :  { %v286_v47 = vmax.f32 %v272_v44, 0.0 }
 0x1c2   :  { %v285_v49 = vmax.f32 %v267_v46, 0.0  ;;  %v442_v50 = vpop.f32.mrb[2].mxu1 }
 0x1c3   :  { %v282_v52 = vadd.f32 %v442_v50, %v185_v48  ;;  %v276_v53 = vpop.f32.mrb[3].mxu1 }
 0x1c4   :  { %v467_v54 = vpack.c.bf16 %v286_v47, %v285_v49  ;;  %v277_v55 = vadd.f32 %v276_v53, %v180_v51 }
 0x1c5   :  { %v288_v56 = vmax.f32 %v282_v52, 0.0 }
 0x1c6   :  { %v287_v57 = vmax.f32 %v277_v55, 0.0  ;;  %468 = vmatpush3.bf16.msra.mxu0 %v467_v54 }
 0x1c7   :  { %469 = vmatprep.subr.bf16.mxu0 %v508_v39 }
 0x1c8   :  { %v470_v58 = vpack.c.bf16 %v288_v56, %v287_v57 }
 0x1ca   :  { %471 = vmatpush3.bf16.msra.mxu0 %v470_v58 }
 0x1cd   :  { %452 = vmatmul.mubr.msk.f32.vlgmr.msra.gmra.mrb[4].mxu0 %vm187_vm1, %v289_v59 }
 0x2a0   :  { %v365_v61 = vpop.f32.mrb[4].mxu0 }
 0x2a1   :  { %v366_v62 = vadd.f32 %v365_v61, %v294_v60  ;;  %v453_v63 = vpop.f32.mrb[5].mxu0 }
 0x2a3   :  { %v399_v0 = vmul.f32 -1.442695, %v366_v62 }
 0x2a5   :  { %479 = vpow2.f32 %v399_v0 }
 0x2af   :  { %v480_v1 = vpop.eup %479 }
 0x2b0   :  { %v372_v2 = vadd.f32 1.0, %v480_v1 }
 0x2b2   :  { %481 = vrcp.f32 %v372_v2 }
 0x2bc   :  { %v482_v3 = vpop.eup %481 }
 0x2bd   :  { %375 = vst [vmem:[#allocation2] sm:$0x7] %v482_v3 }
 0x2be   :  { %494 = shalt.err (!%p491_p4)
}
 0x2bf   :  { %s495_s15 = scalar_lea.hbm %s640_s7, 64 }
 0x2c0   :  { %p496_p5 = scmp.ne.s32.totalorder %s640_s7, %s495_s15  ;;  %p499_p6 = scmp.lt.u32.totalorder %s495_s15, %s640_s7 }
 0x2c2   :  { %p501_p7 = pnand %p499_p6, %p496_p5 }
 0x2c4   :  { %504 = shalt.err (!%p501_p7)
}
 0x2c5   :  { %385 = dma.vmem_to_hbm [thread:$0]  %s383_s12, 64, %s640_s7, [#allocation3]  }
 0x2c6   :  { %505 = dma.done.wait [#allocation3], 64  }
 0x2c7   :  { %506 = vsyncadd [#allocation3], 4294967232 }
 0x2c8   :  { %389 = vsyncpa [#allocation3], 1 }

</bundles_post_ra>
